<compile_context>
chip_gen: v6e
topology: v6e:2x2x1
jax: 0.10.0
libtpu: 0.0.40
codegen_flags: <defaults>
</compile_context>

<pallas_src>
import functools

import jax
import jax.numpy as jnp
from jax import lax
from jax.experimental import pallas as pl
from jax.experimental.pallas import tpu as pltpu


def _triplet_loss_kernel(lhs_ref, rhs_ref, out_ref, *,
                         margin, h, h2, n_cols, tile_cols):
    """One column block of the fused triplet loss.

    lhs_ref: (lhs_rows, D) resident block containing (at least) the first-half
             "negative" features n = feats[:h].
    rhs_ref: (tile_cols, D) streamed column block of the FULL feats array.
    out_ref: (1, 1) running scalar-loss accumulator (same block every step).
    """
    step = pl.program_id(0)

    @pl.when(step == 0)
    def _():
        out_ref[...] = jnp.zeros_like(out_ref)

    n = lhs_ref[...][:h, :].astype(jnp.float32)                       # (h, D)
    f = rhs_ref[...].astype(jnp.float32)                              # (tc, D)

    # Squared row norms.
    n_sq = jnp.sum(n * n, axis=-1, keepdims=True)                     # (h, 1)
    f_sq = jnp.transpose(jnp.sum(f * f, axis=-1, keepdims=True))      # (1, tc)

    # Single fused gram product on the MXU; contraction on the last dim of
    # both operands avoids materializing any transposed operand.
    g = lax.dot_general(
        n, f,
        dimension_numbers=(((1,), (1,)), ((), ())),
        preferred_element_type=jnp.float32,
    )                                                                 # (h, tc)

    # Deferred-norm squared distances: d2[i, j] = (n_sq[i] - 2 g[i, j]) + f_sq[j].
    # Reduce over i BEFORE adding f_sq and BEFORE the sqrt (max/min commute
    # with the monotone sqrt) -> only O(cols) sqrt on the EUP.
    t = n_sq - 2.0 * g                                                # (h, tc)
    col_max = jnp.max(t, axis=0, keepdims=True)                       # (1, tc)
    col_min = jnp.min(t, axis=0, keepdims=True)                       # (1, tc)

    d_max = jnp.sqrt(jnp.maximum(col_max + f_sq, 0.0))   # max_i ||n_i - f_j||
    d_min = jnp.sqrt(jnp.maximum(col_min + f_sq, 0.0))   # min_i ||n_i - f_j||
    hinge = jnp.maximum(jnp.float32(margin) - d_min, 0.0)

    # Global column ids: first h columns belong to the n_d (max) branch, the
    # remaining ones (below the true batch size) to the a_d (hinge) branch.
    col = lax.broadcasted_iota(jnp.int32, (1, tile_cols), 1) + step * tile_cols
    in_n_half = col < h
    in_a_half = (col >= h) & (col < n_cols)

    part_n = jnp.sum(jnp.where(in_n_half, d_max, 0.0), axis=1, keepdims=True)
    part_a = jnp.sum(jnp.where(in_a_half, hinge, 0.0), axis=1, keepdims=True)

    out_ref[...] += part_n * jnp.float32(1.0 / h) + part_a * jnp.float32(1.0 / h2)


def triplet_loss(feats, margin=100.0, *, max_tile_cols=512):
    """feats: (B, D) float array. Returns scalar f32 loss (same math as the torch module)."""
    bs, d = feats.shape
    h = bs // 2
    h2 = bs - h

    # Resident first-half block: exactly (h, D) when h is sublane aligned,
    # otherwise the full (bs, D) array (the kernel slices the first h rows).
    lhs_rows = h if (h % 8 == 0) else bs

    # Column tiling: one block if small, otherwise sublane-aligned tiles so the
    # (h, tile_cols) squared-distance block stays bounded in VMEM and the RHS
    # stream double-buffers. Trailing partial blocks are handled by masking.
    tile_cols = bs if bs <= max_tile_cols else max_tile_cols
    grid = (pl.cdiv(bs, tile_cols),)

    kernel = functools.partial(
        _triplet_loss_kernel,
        margin=float(margin), h=h, h2=h2, n_cols=bs, tile_cols=tile_cols)

    itemsize = jnp.dtype(feats.dtype).itemsize
    cost = pl.CostEstimate(
        flops=2 * h * bs * d + 6 * h * bs,
        transcendentals=2 * bs,
        bytes_accessed=(lhs_rows * d + bs * d) * itemsize + 4,
    )

    out = pl.pallas_call(
        kernel,
        out_shape=jax.ShapeDtypeStruct((1, 1), jnp.float32),
        grid=grid,
        in_specs=[
            pl.BlockSpec((lhs_rows, d), lambda j: (0, 0)),   # resident n-half
            pl.BlockSpec((tile_cols, d), lambda j: (j, 0)),  # streamed columns
        ],
        out_specs=pl.BlockSpec((1, 1), lambda j: (0, 0)),
        compiler_params=pltpu.CompilerParams(
            dimension_semantics=("arbitrary",)),   # column axis carries the accumulator
        cost_estimate=cost,
    )(feats, feats)
    return out[0, 0]


def _reference(feats, margin=100.0):
    bs = feats.shape[0]
    n = feats[: bs // 2]
    a = feats[bs // 2:]
    n_d = jnp.sqrt(
        jnp.maximum(jnp.sum((n[:, None, :] - n[None, :, :]) ** 2, -1), 0.0)
    )
    a_d = jnp.sqrt(
        jnp.maximum(jnp.sum((n[:, None, :] - a[None, :, :]) ** 2, -1), 0.0)
    )
    n_d_max = jnp.max(n_d, axis=0)
    a_d_min = jnp.min(a_d, axis=0)
    a_d_min = jnp.maximum(0.0, margin - a_d_min)
    return jnp.mean(n_d_max) + jnp.mean(a_d_min)


if __name__ == "__main__":
    key = jax.random.PRNGKey(0)
    B, D = 8, 32  # batch=8 (split 4/4), hidden=32
    feats = jax.random.normal(key, (B, D), dtype=jnp.float32) * 3.0

    loss = triplet_loss(feats, margin=100.0)
    loss = jax.block_until_ready(loss)

    ref = _reference(feats, margin=100.0)
    assert jnp.allclose(loss, ref, rtol=1e-4, atol=1e-3), (loss, ref)

    print("KERNEL_OK")
</pallas_src>

<mosaic_0001>
module attributes {stable_mosaic.version = 11 : i64} {
  func.func @_triplet_loss_kernel(%arg0: i32, %arg1: memref<8x32xf32, #tpu.memory_space<vmem>>, %arg2: memref<8x32xf32, #tpu.memory_space<vmem>>, %arg3: memref<1x1xf32, #tpu.memory_space<vmem>>) attributes {dimension_semantics = [#tpu.dimension_semantics<arbitrary>], iteration_bounds = array<i64: 1>, scalar_prefetch = 0 : i64, scratch_operands = 0 : i64, tpu.core_type = #tpu.core_type<tc>, window_params = [{pipeline_mode = #tpu.pipeline_mode<synchronous>, transform_indices = @transform_0, window_bounds = array<i64: 8, 32>}, {transform_indices = @transform_1, window_bounds = array<i64: 8, 32>}, {pipeline_mode = #tpu.pipeline_mode<synchronous>, transform_indices = @transform_2, window_bounds = array<i64: 1, 1>}]} {
    %c0_i32 = arith.constant 0 : i32
    %0 = arith.cmpi eq, %arg0, %c0_i32 : i32
    %1 = arith.extui %0 : i1 to i32
    %c0_i32_0 = arith.constant 0 : i32
    %2 = arith.cmpi ne, %1, %c0_i32_0 : i32
    scf.if %2 {
      %cst_25 = arith.constant 0.000000e+00 : f32
      %61 = vector.broadcast %cst_25 : f32 to vector<1x1xf32>
      %c0_26 = arith.constant 0 : index
      %c0_27 = arith.constant 0 : index
      %62 = vector.load %arg3[%c0_26, %c0_27] : memref<1x1xf32, #tpu.memory_space<vmem>>, vector<1x1xf32>
      tpu.vector_store %arg3[%c0_26, %c0_27], %61 {strides = array<i32>} : memref<1x1xf32, #tpu.memory_space<vmem>>, vector<1x1xf32>,
    } else {
    }
    %c0 = arith.constant 0 : index
    %c0_1 = arith.constant 0 : index
    %3 = vector.load %arg1[%c0, %c0_1] : memref<8x32xf32, #tpu.memory_space<vmem>>, vector<8x32xf32>
    %4 = vector.extract_strided_slice %3 {offsets = [0, 0], sizes = [4, 32], strides = [1, 1]} : vector<8x32xf32> to vector<4x32xf32>
    %c0_2 = arith.constant 0 : index
    %c0_3 = arith.constant 0 : index
    %5 = vector.load %arg2[%c0_2, %c0_3] : memref<8x32xf32, #tpu.memory_space<vmem>>, vector<8x32xf32>
    %6 = arith.mulf %4, %4 : vector<4x32xf32>
    %cst = arith.constant dense<0.000000e+00> : vector<4xf32>
    %7 = vector.multi_reduction <add>, %6, %cst [1] : vector<4x32xf32> to vector<4xf32>
    %8 = vector.shape_cast %7 : vector<4xf32> to vector<4x1xf32>
    %9 = arith.mulf %5, %5 : vector<8x32xf32>
    %cst_4 = arith.constant dense<0.000000e+00> : vector<8xf32>
    %10 = vector.multi_reduction <add>, %9, %cst_4 [1] : vector<8x32xf32> to vector<8xf32>
    %11 = vector.shape_cast %10 : vector<8xf32> to vector<8x1xf32>
    %12 = tpu.transpose %11, [1, 0] : vector<8x1xf32> -> vector<1x8xf32>
    %cst_5 = arith.constant dense<0.000000e+00> : vector<4x8xf32>
    %13 = tpu.matmul %4, %5, %cst_5 {dimension_numbers = #tpu.dot_dimension_numbers<[1], [1], [0], [0], [0, 0, 1, 0], [], []>} : vector<4x32xf32>, vector<8x32xf32>, vector<4x8xf32> -> vector<4x8xf32>
    %cst_6 = arith.constant 2.000000e+00 : f32
    %14 = vector.broadcast %cst_6 : f32 to vector<4x8xf32>
    %15 = arith.mulf %14, %13 : vector<4x8xf32>
    %16 = vector.broadcast %8 : vector<4x1xf32> to vector<4x8xf32>
    %17 = arith.subf %16, %15 : vector<4x8xf32>
    %cst_7 = arith.constant dense<0xFF800000> : vector<8xf32>
    %18 = vector.multi_reduction <maximumf>, %17, %cst_7 [0] : vector<4x8xf32> to vector<8xf32>
    %19 = vector.shape_cast %18 : vector<8xf32> to vector<1x8xf32>
    %cst_8 = arith.constant dense<0x7F800000> : vector<8xf32>
    %20 = vector.multi_reduction <minimumf>, %17, %cst_8 [0] : vector<4x8xf32> to vector<8xf32>
    %21 = vector.shape_cast %20 : vector<8xf32> to vector<1x8xf32>
    %22 = arith.addf %19, %12 : vector<1x8xf32>
    %cst_9 = arith.constant 0.000000e+00 : f32
    %23 = vector.broadcast %cst_9 : f32 to vector<1x8xf32>
    %24 = arith.maximumf %22, %23 : vector<1x8xf32>
    %25 = math.sqrt %24 : vector<1x8xf32>
    %26 = arith.addf %21, %12 : vector<1x8xf32>
    %cst_10 = arith.constant 0.000000e+00 : f32
    %27 = vector.broadcast %cst_10 : f32 to vector<1x8xf32>
    %28 = arith.maximumf %26, %27 : vector<1x8xf32>
    %29 = math.sqrt %28 : vector<1x8xf32>
    %cst_11 = arith.constant 1.000000e+02 : f32
    %30 = vector.broadcast %cst_11 : f32 to vector<1x8xf32>
    %31 = arith.subf %30, %29 : vector<1x8xf32>
    %cst_12 = arith.constant 0.000000e+00 : f32
    %32 = vector.broadcast %cst_12 : f32 to vector<1x8xf32>
    %33 = arith.maximumf %31, %32 : vector<1x8xf32>
    %34 = tpu.iota {dimensions = array<i32: 1>} : vector<1x8xi32>
    %c8_i32 = arith.constant 8 : i32
    %35 = arith.muli %arg0, %c8_i32 : i32
    %36 = vector.broadcast %35 : i32 to vector<1x8xi32>
    %37 = arith.addi %34, %36 : vector<1x8xi32>
    %c4_i32 = arith.constant 4 : i32
    %38 = vector.broadcast %c4_i32 : i32 to vector<1x8xi32>
    %39 = arith.cmpi slt, %37, %38 : vector<1x8xi32>
    %c4_i32_13 = arith.constant 4 : i32
    %40 = vector.broadcast %c4_i32_13 : i32 to vector<1x8xi32>
    %41 = arith.cmpi sge, %37, %40 : vector<1x8xi32>
    %c8_i32_14 = arith.constant 8 : i32
    %42 = vector.broadcast %c8_i32_14 : i32 to vector<1x8xi32>
    %43 = arith.cmpi slt, %37, %42 : vector<1x8xi32>
    %44 = arith.andi %41, %43 : vector<1x8xi1>
    %cst_15 = arith.constant 0.000000e+00 : f32
    %45 = vector.broadcast %cst_15 : f32 to vector<1x8xf32>
    %46 = arith.select %39, %25, %45 : vector<1x8xi1>, vector<1x8xf32>
    %cst_16 = arith.constant dense<0.000000e+00> : vector<1xf32>
    %47 = vector.multi_reduction <add>, %46, %cst_16 [1] : vector<1x8xf32> to vector<1xf32>
    %48 = vector.shape_cast %47 : vector<1xf32> to vector<1x1xf32>
    %cst_17 = arith.constant 0.000000e+00 : f32
    %49 = vector.broadcast %cst_17 : f32 to vector<1x8xf32>
    %50 = arith.select %44, %33, %49 : vector<1x8xi1>, vector<1x8xf32>
    %cst_18 = arith.constant dense<0.000000e+00> : vector<1xf32>
    %51 = vector.multi_reduction <add>, %50, %cst_18 [1] : vector<1x8xf32> to vector<1xf32>
    %52 = vector.shape_cast %51 : vector<1xf32> to vector<1x1xf32>
    %c0_19 = arith.constant 0 : index
    %c0_20 = arith.constant 0 : index
    %53 = vector.load %arg3[%c0_19, %c0_20] : memref<1x1xf32, #tpu.memory_space<vmem>>, vector<1x1xf32>
    %cst_21 = arith.constant 2.500000e-01 : f32
    %54 = vector.broadcast %cst_21 : f32 to vector<1x1xf32>
    %55 = arith.mulf %48, %54 : vector<1x1xf32>
    %cst_22 = arith.constant 2.500000e-01 : f32
    %56 = vector.broadcast %cst_22 : f32 to vector<1x1xf32>
    %57 = arith.mulf %52, %56 : vector<1x1xf32>
    %58 = arith.addf %55, %57 : vector<1x1xf32>
    %59 = arith.addf %53, %58 : vector<1x1xf32>
    %c0_23 = arith.constant 0 : index
    %c0_24 = arith.constant 0 : index
    %60 = vector.load %arg3[%c0_23, %c0_24] : memref<1x1xf32, #tpu.memory_space<vmem>>, vector<1x1xf32>
    tpu.vector_store %arg3[%c0_23, %c0_24], %59 {strides = array<i32>} : memref<1x1xf32, #tpu.memory_space<vmem>>, vector<1x1xf32>,
    return
  }
  func.func @transform_0(%arg0: i32) -> (i32, i32) {
    %c0_i32 = arith.constant 0 : i32
    %c0_i32_0 = arith.constant 0 : i32
    %c0_i32_1 = arith.constant 0 : i32
    return %c0_i32, %c0_i32_0 : i32, i32
  }
  func.func @transform_1(%arg0: i32) -> (i32, i32) {
    %c0_i32 = arith.constant 0 : i32
    %c0_i32_0 = arith.constant 0 : i32
    return %arg0, %c0_i32 : i32, i32
  }
  func.func @transform_2(%arg0: i32) -> (i32, i32) {
    %c0_i32 = arith.constant 0 : i32
    %c0_i32_0 = arith.constant 0 : i32
    %c0_i32_1 = arith.constant 0 : i32
    return %c0_i32, %c0_i32_0 : i32, i32
  }
}

</mosaic_0001>

<bundles_post_ra>
// kernel: tpu_custom_call.1
= control target key start
LH: loop header
LB: loop body
LE: loop exit
PB: predicated region body
PF: predicated region fallthrough
CT: control target
= control target key end

     0   :  { %7 = vsyncpa [#allocation3], 0  ;;  %s357_s0 = inlined_call_operand.hbm [shape: f32[8,32], index: 0, kind: input, shape index: {}]   ;;  %s358_s1 = inlined_call_operand.hbm [shape: f32[8,32], index: 1, kind: input, shape index: {}]   ;;  %s359_s2 = inlined_call_operand.hbm [shape: f32[1,1], index: 2, kind: output, shape index: {}]  }
   0x1   :  { %8 = vsyncpa [#allocation6], 0 }
   0x2   :  { %9 = vsyncpa [#allocation4], 0  ;;  %s324_s9 = smov [#allocation2]   ;;  %s325_s11 = smov [#allocation5]  }
   0x3   :  { %s16_s10 = sshll.u32 %s324_s9, 4  ;;  %s26_s12 = sshll.u32 %s325_s11, 4  ;;  %s17_s10 = int_to_ptr.vmem [resolvable:$true] %s16_s10  ;;  %s27_s12 = int_to_ptr.vmem [resolvable:$true] %s26_s12 }
   0x4   :  { %s266_s13 = scalar_lea.vmem %s17_s10, 128  ;;  %p271_p1 = scmp.lt.s32.totalorder %s17_s10, %s17_s10 }
   0x5   :  { %p267_p0 = scmp.ne.s32.totalorder %s17_s10, %s266_s13  ;;  %p272_p2 = scmp.lt.s32.totalorder %s266_s13, %s266_s13 }
   0x7   :  { %p273_p3 = por %p272_p2, %p271_p1 }
   0x9   :  { %p274_p4 = pnand %p273_p3, %p267_p0 }
   0xb   :  { %277 = shalt.err (!%p274_p4)
}
   0xc   :  { %19 = dma.hbm_to_vmem [thread:$0]  %s357_s0, 128, %s17_s10, [#allocation3]  }
   0xd   :  { %s286_s16 = scalar_lea.vmem %s27_s12, 128  ;;  %p291_p6 = scmp.lt.s32.totalorder %s27_s12, %s27_s12 }
   0xe   :  { %p287_p5 = scmp.ne.s32.totalorder %s27_s12, %s286_s16  ;;  %p292_p7 = scmp.lt.s32.totalorder %s286_s16, %s286_s16 }
  0x10   :  { %p293_p8 = por %p292_p7, %p291_p6 }
  0x12   :  { %p294_p9 = pnand %p293_p8, %p287_p5 }
  0x14   :  { %297 = shalt.err (!%p294_p9)
}
  0x15   :  { %29 = dma.hbm_to_vmem [thread:$0]  %s358_s1, 128, %s27_s12, [#allocation6]  }
  0x16   :  { %318 = dma.done.wait [#allocation3], 128  }
  0x17   :  { %319 = vsyncadd [#allocation3], 4294967168 }
  0x18   :  { %320 = dma.done.wait [#allocation6], 128  }
  0x19   :  { %321 = vsyncadd [#allocation6], 4294967168  ;;  %vm40_vm0 = vcmask 0   ;;  %v326_v0 = vmov 0.0   ;;  %vm327_vm1 = vmmov 0   ;;  %v43_v1 = vld [vmem:[#allocation5] sm:$0xff]  ;;  %v199_v32 = vlaneseq }
  0x1a   :  { %41 = vst.msk [vmem:[#allocation7] sm:$0x1] %vm40_vm0, %v326_v0  ;;  %244 = vmatprep.subr.mxu0 %v326_v0  ;;  %246 = vmatprep.mubr.msk.f32.mxu0 %vm327_vm1, %v326_v0  ;;  %vm50_vm2 = vcmask 261120   ;;  %v42_v2 = vld [vmem:[#allocation2] sm:$0xff]  ;;  %v49_v3 = vmul.f32 %v43_v1, %v43_v1  ;;  %vm45_vm3 = vcmask 257024   ;;  %vm164_vm4 = vcmask 60416  }
  0x1b   :  { %245 = vmatpush3.xpose.msk.msra.mxu0 %vm50_vm2, %v43_v1  ;;  %v44_v4 = vmul.f32 %v42_v2, %v42_v2  ;;  %v200_v33 = vand.u32 127, %v199_v32  ;;  %vm209_vm6 = vcmask 57344   ;;  %s328_s0 = smov [#allocation7]  }
  0x1c   :  { %v51_v5 = vsel %vm50_vm2, %v49_v3, 0.0  ;;  %s230_s1 = sshll.u32 %s328_s0, 4  ;;  %s231_s1 = int_to_ptr.vmem [resolvable:$true] %s230_s1 }
  0x1d   :  { %52 = vadd.xlane.f32.xlu0 %v51_v5  ;;  %v46_v6 = vsel %vm45_vm3, %v44_v4, 0.0  ;;  %vm204_vm5 = vcmp.lt.s32.totalorder %v200_v33, 4  ;;  %vm205_vm8 = vcmp.ge.s32.totalorder %v200_v33, 4  ;;  %vm206_vm12 = vcmp.lt.s32.totalorder %v200_v33, 8  ;;  %s298_s19 = scalar_lea.vmem %s231_s1, 16  ;;  %s302_s20 = scalar_lea.vmem %s231_s1, 32 }
  0x1e   :  { %247 = vmatmul.mubr.msk.f32.vlgmr.msra.gmra.mxu0 %vm50_vm2, %v42_v2  ;;  %vm207_vm13 = vmand %vm205_vm8, %vm206_vm12  ;;  %p299_p10 = scmp.ne.s32.totalorder %s231_s1, %s298_s19  ;;  %p303_p11 = scmp.lt.s32.totalorder %s231_s1, %s231_s1 }
  0x1f   :  { %p304_p12 = scmp.lt.s32.totalorder %s302_s20, %s298_s19 }
  0x21   :  { %47 = vadd.xlane.f32.xlu0 %v46_v6  ;;  %v217_v54 = vld [vmem:[#allocation7] sm:$0x1]  ;;  %p305_p13 = por %p304_p12, %p303_p11 }
  0x23   :  { %p306_p0 = pnand %p305_p13, %p299_p10 }
  0xa6   :  { %v53_v7 = vpop.xlane.xlu0 %52 }
  0xa7   :  { %54 = vxpose.xlu1.b32.start.end [1/1] (short) (narrow) %v53_v7, 8 }
  0xaa   :  { %v48_v11 = vpop.xlane.xlu0 %47 }
  0xde   :  { %v158_v8 = vpop.f32.mrf.mxu0 }
  0xdf   :  { %v162_v10 = vmul.f32 2.0, %v158_v8 }
  0xe0   :  { %v248_v9 = vpop.f32.mrf.mxu0 }
  0xe1   :  { %v163_v12 = vsub.f32 %v48_v11, %v162_v10 }
  0xe3   :  { %v165_v13 = vsel %vm164_vm4, %v163_v12, -inf  ;;  %v172_v14 = vsel %vm164_vm4, %v163_v12, inf }
  0xe4   :  { %v166_v15 = vrot.slane %v165_v13, 4  ;;  %v173_v16 = vrot.slane %v172_v14, 4 }
  0xe6   :  { %v167_v17 = vmax.f32 %v165_v13, %v166_v15  ;;  %v174_v18 = vmin.f32 %v172_v14, %v173_v16 }
  0xe8   :  { %v168_v19 = vrot.slane %v167_v17, 2  ;;  %v175_v20 = vrot.slane %v174_v18, 2 }
  0xea   :  { %v169_v21 = vmax.f32 %v167_v17, %v168_v19  ;;  %v176_v22 = vmin.f32 %v174_v18, %v175_v20 }
  0xec   :  { %v170_v23 = vrot.slane %v169_v21, 1  ;;  %v177_v24 = vrot.slane %v176_v22, 1 }
  0xee   :  { %v171_v25 = vmax.f32 %v169_v21, %v170_v23  ;;  %v178_v26 = vmin.f32 %v176_v22, %v177_v24 }
 0x123   :  { %v70_v27 = vpop.trf.xlu1 }
 0x124   :  { %v179_v28 = vadd.f32 %v171_v25, %v70_v27  ;;  %v188_v29 = vadd.f32 %v178_v26, %v70_v27 }
 0x126   :  { %v180_v30 = vmax.f32 %v179_v28, 0.0  ;;  %v189_v31 = vmax.f32 %v188_v29, 0.0 }
 0x128   :  { %254 = vrsqrt.f32 %v180_v30  ;;  %vm183_vm7 = vcmp.eq.f32.partialorder %v180_v30, inf  ;;  %v186_v37 = vand.u32 2147483648, %v180_v30  ;;  %vm185_vm9 = vcmp.eq.f32.partialorder %v180_v30, 0.0 }
 0x129   :  { %256 = vrsqrt.f32 %v189_v31  ;;  %vm192_vm10 = vcmp.eq.f32.partialorder %v189_v31, inf  ;;  %v195_v40 = vand.u32 2147483648, %v189_v31  ;;  %vm194_vm11 = vcmp.eq.f32.partialorder %v189_v31, 0.0 }
 0x135   :  { %v255_v34 = vpop.eup %254 }
 0x136   :  { %v257_v35 = vpop.eup %256  ;;  %v182_v36 = vmul.f32 %v255_v34, %v180_v30 }
 0x137   :  { %v191_v38 = vmul.f32 %v257_v35, %v189_v31 }
 0x138   :  { %v184_v39 = vsel %vm183_vm7, %v180_v30, %v182_v36 }
 0x139   :  { %v187_v41 = vsel %vm185_vm9, %v186_v37, %v184_v39  ;;  %v193_v42 = vsel %vm192_vm10, %v189_v31, %v191_v38 }
 0x13a   :  { %v208_v43 = vsel %vm204_vm5, %v187_v41, 0.0  ;;  %v196_v44 = vsel %vm194_vm11, %v195_v40, %v193_v42 }
 0x13b   :  { %v210_v45 = vsel %vm209_vm6, %v208_v43, 0.0  ;;  %v197_v46 = vsub.f32 100.0, %v196_v44 }
 0x13c   :  { %211 = vadd.xlane.f32.xlu1 %v210_v45 }
 0x13d   :  { %v198_v47 = vmax.f32 %v197_v46, 0.0 }
 0x13f   :  { %v213_v48 = vsel %vm207_vm13, %v198_v47, 0.0 }
 0x140   :  { %v214_v49 = vsel %vm209_vm6, %v213_v48, 0.0 }
 0x141   :  { %215 = vadd.xlane.f32.xlu0 %v214_v49 }
 0x1c5   :  { %v212_v50 = vpop.xlane.xlu1 %211 }
 0x1c6   :  { %v218_v52 = vmul.f32 0.25, %v212_v50 }
 0x1ca   :  { %v216_v51 = vpop.xlane.xlu0 %215 }
 0x1cb   :  { %v219_v53 = vmul.f32 0.25, %v216_v51 }
 0x1cd   :  { %v220_v55 = vadd.f32 %v219_v53, %v218_v52 }
 0x1cf   :  { %v221_v56 = vadd.f32 %v220_v55, %v217_v54 }
 0x1d1   :  { %223 = vst.msk [vmem:[#allocation7] sm:$0x1] %vm40_vm0, %v221_v56 }
 0x1d2   :  { %309 = shalt.err (!%p306_p0)
}
 0x1d3   :  { %233 = dma.vmem_to_hbm [thread:$0]  %s231_s1, 16, %s359_s2, [#allocation4]  }
 0x1d4   :  { %322 = dma.done.wait [#allocation4], 16  }
 0x1d5   :  { %323 = vsyncadd [#allocation4], 4294967280 }
 0x1d6   :  { %237 = vsyncpa [#allocation3], 1 }
 0x1d7   :  { %238 = vsyncpa [#allocation6], 1 }
 0x1d8   :  { %239 = vsyncpa [#allocation4], 1 }

</bundles_post_ra>
